<compile_context>
chip_gen: v7x
topology: tpu7x:2x2x1
jax: 0.10.0
libtpu: 0.0.40
codegen_flags: <defaults>
</compile_context>

<pallas_src>
import jax
import jax.numpy as jnp
from jax.experimental import pallas as pl
from jax.experimental.pallas import tpu as pltpu

# ---------------- problem sizes (small, synthetic) ----------------
N = 2             # batch (images)
C = 64            # backbone feature channels (stand-in for 1024)
H = 16
W = 16
R = 4             # proposals per image
NR = N * R        # total ROIs
POOL = 8          # ROI crop / pool size
PP = POOL * POOL  # pixels per ROI crop
C2 = 128          # head output channels (stand-in for 2048)
K = 32            # predictor classes
KPAD = 128        # lane-dense padded class dim (sliced back to K in the wrapper)


# ---------------- fused kernel: roi_heads + predictor, one image per step ----
def fused_baseline_kernel(crops_ref, feat_ref, seg_ref,
                          w_head_ref, b_head_ref,
                          w_glob_ref, w_roi_ref, b_pred_ref,
                          roi_out_ref, pred_out_ref):
    # crops_ref: (1, R*PP, C)  bf16 -- all R ROI crops of this image, row-major
    # feat_ref:  (1, H*W, C)   f32  -- full feature map (flattened HW)
    # seg_ref:   (R, R*PP)     f32  -- per-ROI segment-mean matrix
    # w_head_ref:(C, C2) bf16,  b_head_ref:(1, C2) f32
    # w_glob_ref:(C, KPAD) f32, w_roi_ref:(C2, KPAD) f32, b_pred_ref:(1, KPAD) f32
    # roi_out_ref:(1, R, C2) f32, pred_out_ref:(1, 1, KPAD) f32

    # ---- roi_heads: 1x1-conv head as a single MXU matmul over all R crops + ReLU
    lhs = crops_ref[0]                                                # (R*PP, C) bf16
    h = jnp.dot(lhs, w_head_ref[...], preferred_element_type=jnp.float32)
    h = jnp.maximum(h + b_head_ref[...], 0.0)                         # (R*PP, C2) f32

    # per-ROI spatial average pool as a matmul with the segment-mean matrix
    pooled = jnp.dot(seg_ref[...], h,
                     preferred_element_type=jnp.float32)              # (R, C2)
    roi_out_ref[0] = pooled                                           # lane-dense (4,128)

    # ---- predictor: global avg pool + roi mean + fused linear classifier
    glob = jnp.mean(feat_ref[0], axis=0, keepdims=True)               # (1, C)
    roi_mean = jnp.mean(pooled, axis=0, keepdims=True)                # (1, C2)
    logits = (jnp.dot(glob, w_glob_ref[...], preferred_element_type=jnp.float32)
              + jnp.dot(roi_mean, w_roi_ref[...], preferred_element_type=jnp.float32)
              + b_pred_ref[...])                                      # (1, KPAD)
    pred_out_ref[0] = logits                                          # full 128-lane store


# ---------------- wrapper: Baseline.forward ----------------
def baseline_forward(features_nchw, proposals, params):
    """
    features_nchw: (N, C, H, W) float32  (PyTorch NCHW convention)
    proposals:     (N, R, 4) float32 boxes (x0, y0, x1, y1) in feature coords
    returns:       (N, K) float32 prediction logits
    """
    # layout: NCHW -> NHWC so channels sit on the TPU lane dimension
    feats_nhwc = jnp.transpose(features_nchw, (0, 2, 3, 1)).astype(jnp.float32)

    # glue: proposal boxes -> clamped, POOL-aligned integer crop starts + batch idx
    boxes = proposals.reshape(NR, 4)
    x0s = jnp.clip((boxes[:, 0] // POOL).astype(jnp.int32) * POOL, 0, W - POOL)
    y0s = jnp.clip((boxes[:, 1] // POOL).astype(jnp.int32) * POOL, 0, H - POOL)
    bidx = jnp.repeat(jnp.arange(N, dtype=jnp.int32), R)

    # gather all ROI crops in the wrapper (clamped dynamic_slice: no in-kernel OOB
    # risk, no in-kernel sublane-merging reshape)
    def crop_one(b, y0, x0):
        return jax.lax.dynamic_slice(
            feats_nhwc, (b, y0, x0, 0), (1, POOL, POOL, C))[0]         # (POOL, POOL, C)

    crops = jax.vmap(crop_one)(bidx, y0s, x0s)                         # (NR, POOL, POOL, C)
    crops = crops.reshape(N, R * PP, C).astype(jnp.bfloat16)           # (N, R*PP, C)

    feat_flat = feats_nhwc.reshape(N, H * W, C)                        # (N, H*W, C)

    # constant per-ROI segment-mean matrix: row r averages rows [r*PP, (r+1)*PP)
    seg = jnp.repeat(jnp.eye(R, dtype=jnp.float32), PP, axis=1) / float(PP)

    # pad the classifier to a full 128-lane output (sliced back below)
    w_glob = jnp.zeros((C, KPAD), jnp.float32).at[:, :K].set(params["w_glob"])
    w_roi = jnp.zeros((C2, KPAD), jnp.float32).at[:, :K].set(params["w_roi"])
    b_pred = jnp.zeros((1, KPAD), jnp.float32).at[:, :K].set(params["b_pred"])

    grid_spec = pltpu.PrefetchScalarGridSpec(
        num_scalar_prefetch=0,
        grid=(N,),
        in_specs=[
            pl.BlockSpec((1, R * PP, C), lambda n: (n, 0, 0)),   # crops (per image)
            pl.BlockSpec((1, H * W, C),  lambda n: (n, 0, 0)),   # full feature map
            pl.BlockSpec((R, R * PP),    lambda n: (0, 0)),      # segment-mean matrix
            pl.BlockSpec((C, C2),        lambda n: (0, 0)),      # w_head (resident)
            pl.BlockSpec((1, C2),        lambda n: (0, 0)),      # b_head
            pl.BlockSpec((C, KPAD),      lambda n: (0, 0)),      # w_glob (padded)
            pl.BlockSpec((C2, KPAD),     lambda n: (0, 0)),      # w_roi  (padded)
            pl.BlockSpec((1, KPAD),      lambda n: (0, 0)),      # b_pred (padded)
        ],
        out_specs=[
            pl.BlockSpec((1, R, C2),   lambda n: (n, 0, 0)),     # roi features 'x'
            pl.BlockSpec((1, 1, KPAD), lambda n: (n, 0, 0)),     # logits (padded)
        ],
    )

    roi_feats, pred_pad = pl.pallas_call(
        fused_baseline_kernel,
        out_shape=(jax.ShapeDtypeStruct((N, R, C2), jnp.float32),
                   jax.ShapeDtypeStruct((N, 1, KPAD), jnp.float32)),
        grid_spec=grid_spec,
        compiler_params=pltpu.CompilerParams(
            dimension_semantics=("parallel",)),
    )(crops, feat_flat, seg,
      params["w_head"].astype(jnp.bfloat16), params["b_head"],
      w_glob, w_roi, b_pred)

    del roi_feats  # 'x' in the original module is consumed only by the (fused) predictor
    return pred_pad[:, 0, :K]                                          # (N, K)


def init_params(key):
    k1, k2, k3, k4 = jax.random.split(key, 4)
    scale = 0.05
    return {
        "w_head": scale * jax.random.normal(k1, (C, C2), jnp.float32),
        "b_head": jnp.zeros((1, C2), jnp.float32),
        "w_glob": scale * jax.random.normal(k2, (C, K), jnp.float32),
        "w_roi":  scale * jax.random.normal(k3, (C2, K), jnp.float32),
        "b_pred": 0.01 * jax.random.normal(k4, (1, K), jnp.float32),
    }


if __name__ == "__main__":
    key = jax.random.PRNGKey(0)
    kf, kp, kw = jax.random.split(key, 3)

    features = jax.random.normal(kf, (N, C, H, W), jnp.float32)        # NCHW
    # deterministic proposals: (x0, y0, x1, y1) within the 16x16 feature map
    xy0 = jax.random.uniform(kp, (N, R, 2), minval=0.0, maxval=float(W - 1))
    proposals = jnp.concatenate([xy0, xy0 + POOL], axis=-1)            # (N, R, 4)

    params = init_params(kw)

    pred = jax.jit(baseline_forward)(features, proposals, params)
    pred = jax.block_until_ready(pred)
    assert pred.shape == (N, K) and pred.dtype == jnp.float32
    print("KERNEL_OK")
</pallas_src>

<mosaic_0001>
module attributes {stable_mosaic.version = 11 : i64} {
  func.func @fused_baseline_kernel(%arg0: i32, %arg1: memref<1x256x64xbf16, #tpu.memory_space<vmem>>, %arg2: memref<1x256x64xf32, #tpu.memory_space<vmem>>, %arg3: memref<4x256xf32, #tpu.memory_space<vmem>>, %arg4: memref<64x128xbf16, #tpu.memory_space<vmem>>, %arg5: memref<1x128xf32, #tpu.memory_space<vmem>>, %arg6: memref<64x128xf32, #tpu.memory_space<vmem>>, %arg7: memref<128x128xf32, #tpu.memory_space<vmem>>, %arg8: memref<1x128xf32, #tpu.memory_space<vmem>>, %arg9: memref<1x4x128xf32, #tpu.memory_space<vmem>>, %arg10: memref<1x1x128xf32, #tpu.memory_space<vmem>>) attributes {dimension_semantics = [#tpu.dimension_semantics<parallel>], iteration_bounds = array<i64: 2>, scalar_prefetch = 0 : i64, scratch_operands = 0 : i64, tpu.core_type = #tpu.core_type<tc>, window_params = [{transform_indices = @transform_0, window_bounds = array<i64: 1, 256, 64>}, {transform_indices = @transform_1, window_bounds = array<i64: 1, 256, 64>}, {pipeline_mode = #tpu.pipeline_mode<synchronous>, transform_indices = @transform_2, window_bounds = array<i64: 4, 256>}, {pipeline_mode = #tpu.pipeline_mode<synchronous>, transform_indices = @transform_3, window_bounds = array<i64: 64, 128>}, {pipeline_mode = #tpu.pipeline_mode<synchronous>, transform_indices = @transform_4, window_bounds = array<i64: 1, 128>}, {pipeline_mode = #tpu.pipeline_mode<synchronous>, transform_indices = @transform_5, window_bounds = array<i64: 64, 128>}, {pipeline_mode = #tpu.pipeline_mode<synchronous>, transform_indices = @transform_6, window_bounds = array<i64: 128, 128>}, {pipeline_mode = #tpu.pipeline_mode<synchronous>, transform_indices = @transform_7, window_bounds = array<i64: 1, 128>}, {transform_indices = @transform_8, window_bounds = array<i64: 1, 4, 128>}, {transform_indices = @transform_9, window_bounds = array<i64: 1, 1, 128>}]} {
    %c0 = arith.constant 0 : index
    %c0_0 = arith.constant 0 : index
    %c0_1 = arith.constant 0 : index
    %0 = vector.load %arg1[%c0, %c0_0, %c0_1] : memref<1x256x64xbf16, #tpu.memory_space<vmem>>, vector<1x256x64xbf16>
    %1 = vector.shape_cast %0 : vector<1x256x64xbf16> to vector<256x64xbf16>
    %c0_2 = arith.constant 0 : index
    %c0_3 = arith.constant 0 : index
    %2 = vector.load %arg4[%c0_2, %c0_3] : memref<64x128xbf16, #tpu.memory_space<vmem>>, vector<64x128xbf16>
    %cst = arith.constant dense<0.000000e+00> : vector<256x128xf32>
    %3 = tpu.matmul %1, %2, %cst {dimension_numbers = #tpu.dot_dimension_numbers<[1], [0], [0], [1], [0, 0, 1, 1], [], []>} : vector<256x64xbf16>, vector<64x128xbf16>, vector<256x128xf32> -> vector<256x128xf32>
    %c0_4 = arith.constant 0 : index
    %c0_5 = arith.constant 0 : index
    %4 = vector.load %arg5[%c0_4, %c0_5] : memref<1x128xf32, #tpu.memory_space<vmem>>, vector<1x128xf32>
    %5 = vector.broadcast %4 : vector<1x128xf32> to vector<256x128xf32>
    %6 = arith.addf %3, %5 : vector<256x128xf32>
    %cst_6 = arith.constant 0.000000e+00 : f32
    %7 = vector.broadcast %cst_6 : f32 to vector<256x128xf32>
    %8 = arith.maximumf %6, %7 : vector<256x128xf32>
    %c0_7 = arith.constant 0 : index
    %c0_8 = arith.constant 0 : index
    %9 = vector.load %arg3[%c0_7, %c0_8] : memref<4x256xf32, #tpu.memory_space<vmem>>, vector<4x256xf32>
    %cst_9 = arith.constant dense<0.000000e+00> : vector<4x128xf32>
    %10 = tpu.matmul %9, %8, %cst_9 {dimension_numbers = #tpu.dot_dimension_numbers<[1], [0], [0], [1], [0, 0, 1, 1], [], []>} : vector<4x256xf32>, vector<256x128xf32>, vector<4x128xf32> -> vector<4x128xf32>
    %c0_10 = arith.constant 0 : index
    %c0_11 = arith.constant 0 : index
    %c0_12 = arith.constant 0 : index
    %11 = vector.load %arg9[%c0_10, %c0_11, %c0_12] : memref<1x4x128xf32, #tpu.memory_space<vmem>>, vector<1x4x128xf32>
    %12 = vector.shape_cast %11 : vector<1x4x128xf32> to vector<4x128xf32>
    %13 = vector.shape_cast %10 : vector<4x128xf32> to vector<1x4x128xf32>
    tpu.vector_store %arg9[%c0_10, %c0_11, %c0_12], %13 {strides = array<i32>} : memref<1x4x128xf32, #tpu.memory_space<vmem>>, vector<1x4x128xf32>,
    %c0_13 = arith.constant 0 : index
    %c0_14 = arith.constant 0 : index
    %c0_15 = arith.constant 0 : index
    %14 = vector.load %arg2[%c0_13, %c0_14, %c0_15] : memref<1x256x64xf32, #tpu.memory_space<vmem>>, vector<1x256x64xf32>
    %15 = vector.shape_cast %14 : vector<1x256x64xf32> to vector<256x64xf32>
    %cst_16 = arith.constant dense<0.000000e+00> : vector<64xf32>
    %16 = vector.multi_reduction <add>, %15, %cst_16 [0] : vector<256x64xf32> to vector<64xf32>
    %17 = vector.shape_cast %16 : vector<64xf32> to vector<1x64xf32>
    %cst_17 = arith.constant 2.560000e+02 : f32
    %18 = vector.broadcast %cst_17 : f32 to vector<1x64xf32>
    %19 = arith.divf %17, %18 : vector<1x64xf32>
    %cst_18 = arith.constant dense<0.000000e+00> : vector<128xf32>
    %20 = vector.multi_reduction <add>, %10, %cst_18 [0] : vector<4x128xf32> to vector<128xf32>
    %21 = vector.shape_cast %20 : vector<128xf32> to vector<1x128xf32>
    %cst_19 = arith.constant 4.000000e+00 : f32
    %22 = vector.broadcast %cst_19 : f32 to vector<1x128xf32>
    %23 = arith.divf %21, %22 : vector<1x128xf32>
    %c0_20 = arith.constant 0 : index
    %c0_21 = arith.constant 0 : index
    %24 = vector.load %arg6[%c0_20, %c0_21] : memref<64x128xf32, #tpu.memory_space<vmem>>, vector<64x128xf32>
    %cst_22 = arith.constant dense<0.000000e+00> : vector<1x128xf32>
    %25 = tpu.matmul %19, %24, %cst_22 {dimension_numbers = #tpu.dot_dimension_numbers<[1], [0], [0], [1], [0, 0, 1, 1], [], []>} : vector<1x64xf32>, vector<64x128xf32>, vector<1x128xf32> -> vector<1x128xf32>
    %c0_23 = arith.constant 0 : index
    %c0_24 = arith.constant 0 : index
    %26 = vector.load %arg7[%c0_23, %c0_24] : memref<128x128xf32, #tpu.memory_space<vmem>>, vector<128x128xf32>
    %cst_25 = arith.constant dense<0.000000e+00> : vector<1x128xf32>
    %27 = tpu.matmul %23, %26, %cst_25 {dimension_numbers = #tpu.dot_dimension_numbers<[1], [0], [0], [1], [0, 0, 1, 1], [], []>} : vector<1x128xf32>, vector<128x128xf32>, vector<1x128xf32> -> vector<1x128xf32>
    %28 = arith.addf %25, %27 : vector<1x128xf32>
    %c0_26 = arith.constant 0 : index
    %c0_27 = arith.constant 0 : index
    %29 = vector.load %arg8[%c0_26, %c0_27] : memref<1x128xf32, #tpu.memory_space<vmem>>, vector<1x128xf32>
    %30 = arith.addf %28, %29 : vector<1x128xf32>
    %c0_28 = arith.constant 0 : index
    %c0_29 = arith.constant 0 : index
    %c0_30 = arith.constant 0 : index
    %31 = vector.load %arg10[%c0_28, %c0_29, %c0_30] : memref<1x1x128xf32, #tpu.memory_space<vmem>>, vector<1x1x128xf32>
    %32 = vector.shape_cast %31 : vector<1x1x128xf32> to vector<1x128xf32>
    %33 = vector.shape_cast %30 : vector<1x128xf32> to vector<1x1x128xf32>
    tpu.vector_store %arg10[%c0_28, %c0_29, %c0_30], %33 {strides = array<i32>} : memref<1x1x128xf32, #tpu.memory_space<vmem>>, vector<1x1x128xf32>,
    return
  }
  func.func @transform_0(%arg0: i32) -> (i32, i32, i32) {
    %c0_i32 = arith.constant 0 : i32
    %c0_i32_0 = arith.constant 0 : i32
    %c0_i32_1 = arith.constant 0 : i32
    return %arg0, %c0_i32, %c0_i32_0 : i32, i32, i32
  }
  func.func @transform_1(%arg0: i32) -> (i32, i32, i32) {
    %c0_i32 = arith.constant 0 : i32
    %c0_i32_0 = arith.constant 0 : i32
    %c0_i32_1 = arith.constant 0 : i32
    return %arg0, %c0_i32, %c0_i32_0 : i32, i32, i32
  }
  func.func @transform_2(%arg0: i32) -> (i32, i32) {
    %c0_i32 = arith.constant 0 : i32
    %c0_i32_0 = arith.constant 0 : i32
    %c0_i32_1 = arith.constant 0 : i32
    return %c0_i32, %c0_i32_0 : i32, i32
  }
  func.func @transform_3(%arg0: i32) -> (i32, i32) {
    %c0_i32 = arith.constant 0 : i32
    %c0_i32_0 = arith.constant 0 : i32
    %c0_i32_1 = arith.constant 0 : i32
    return %c0_i32, %c0_i32_0 : i32, i32
  }
  func.func @transform_4(%arg0: i32) -> (i32, i32) {
    %c0_i32 = arith.constant 0 : i32
    %c0_i32_0 = arith.constant 0 : i32
    %c0_i32_1 = arith.constant 0 : i32
    return %c0_i32, %c0_i32_0 : i32, i32
  }
  func.func @transform_5(%arg0: i32) -> (i32, i32) {
    %c0_i32 = arith.constant 0 : i32
    %c0_i32_0 = arith.constant 0 : i32
    %c0_i32_1 = arith.constant 0 : i32
    return %c0_i32, %c0_i32_0 : i32, i32
  }
  func.func @transform_6(%arg0: i32) -> (i32, i32) {
    %c0_i32 = arith.constant 0 : i32
    %c0_i32_0 = arith.constant 0 : i32
    %c0_i32_1 = arith.constant 0 : i32
    return %c0_i32, %c0_i32_0 : i32, i32
  }
  func.func @transform_7(%arg0: i32) -> (i32, i32) {
    %c0_i32 = arith.constant 0 : i32
    %c0_i32_0 = arith.constant 0 : i32
    %c0_i32_1 = arith.constant 0 : i32
    return %c0_i32, %c0_i32_0 : i32, i32
  }
  func.func @transform_8(%arg0: i32) -> (i32, i32, i32) {
    %c0_i32 = arith.constant 0 : i32
    %c0_i32_0 = arith.constant 0 : i32
    %c0_i32_1 = arith.constant 0 : i32
    return %arg0, %c0_i32, %c0_i32_0 : i32, i32, i32
  }
  func.func @transform_9(%arg0: i32) -> (i32, i32, i32) {
    %c0_i32 = arith.constant 0 : i32
    %c0_i32_0 = arith.constant 0 : i32
    %c0_i32_1 = arith.constant 0 : i32
    return %arg0, %c0_i32, %c0_i32_0 : i32, i32, i32
  }
}

</mosaic_0001>

<bundles_post_ra>
// kernel: baseline_forward.1
= control target key start
LH: loop header
LB: loop body
LE: loop exit
PB: predicated region body
PF: predicated region fallthrough
CT: control target
= control target key end

     0   :  { %15 = vsyncpa [#allocation3], 0  ;;  %s2164_s0 = inlined_call_operand.vmem [shape: bf16[2,256,64], index: 0, kind: input, shape index: {}]   ;;  %s2165_s1 = inlined_call_operand.vmem [shape: f32[2,256,64], index: 1, kind: input, shape index: {}]   ;;  %s2166_s2 = inlined_call_operand.vmem [shape: f32[4,256], index: 2, kind: input, shape index: {}]   ;;  %s2167_s3 = inlined_call_operand.vmem [shape: bf16[64,128], index: 3, kind: input, shape index: {}]   ;;  %s2168_s4 = inlined_call_operand.vmem [shape: f32[1,128], index: 4, kind: input, shape index: {}]   ;;  %s2169_s5 = inlined_call_operand.vmem [shape: f32[64,128], index: 5, kind: input, shape index: {}]   ;;  %s2170_s6 = inlined_call_operand.vmem [shape: f32[128,128], index: 6, kind: input, shape index: {}]   ;;  %s2171_s7 = inlined_call_operand.vmem [shape: f32[1,128], index: 7, kind: input, shape index: {}]   ;;  %s2172_s8 = inlined_call_operand.hbm [shape: f32[2,4,128], index: 8, kind: output, shape index: {0}]   ;;  %s2173_s9 = inlined_call_operand.hbm [shape: f32[2,1,128], index: 9, kind: output, shape index: {1}]  }
   0x1   :  { %17 = vsyncpa [#allocation3 + $0x1], 0 }
   0x2   :  { %18 = vsyncpa [#allocation5], 0 }
   0x3   :  { %20 = vsyncpa [#allocation5 + $0x1], 0  ;;  %s1759_s30 = smov 0   ;;  %s1761_s10 = smov 0  }
   0x4   :  { %s1763_s11 = smov 0   ;;  %s1765_s12 = smov 0  }
   0x5 LB: > { %s1780_s13 = sadd.s32 4294967295, %s1702_s12   ;;  %s1243_s14 = sadd.s32 4294967294, %s1702_s12   ;;  %s1702_s12 = sphi %s1765_s12, %s2179_s12   ;;  %s1698_s11 = sphi %s1763_s11, %s2178_s11   ;;  %s1694_s10 = sphi %s1761_s10, %s2177_s10   ;;  %s1690_s30 = sphi %s1759_s30, %s2176_s30  }
   0x6   : > { %s1784_s15 = sadd.s32 1, %s1702_s12   ;;  %s211_s16 = sadd.s32 1, %s1698_s11 }
   0x7   : > { %s208_s17 = ssub.s32 %s1702_s12, %s1784_s15  ;;  %p221_p0 = scmp.ne.s32.totalorder %s1698_s11, %s1694_s10 }
   0x8   : > { %p209_p1 = scmp.eq.s32.totalorder %s208_s17, 0  ;;  %p222_p2 = scmp.eq.s32.totalorder %s1780_s13, 1 }
   0x9   : > { %p227_p3 = scmp.ne.s32.totalorder %s1694_s10, %s1690_s30  ;;  %p228_p4 = scmp.eq.s32.totalorder %s1243_s14, 1 }
   0xa   : > { %s1795_s18 = scalar_select %p209_p1, %s1698_s11, %s211_s16  }
   0xb   : > { %p1797_p5 = por %p222_p2, %p221_p0  ;;  %p1801_p6 = por %p228_p4, %p227_p3 }
   0xc   : > { %p1246_p7 = scmp.ge.s32.totalorder %s1702_s12, 1  ;;  %p306_p8 = scmp.lt.s32.totalorder %s1702_s12, 3 }
   0xe   : > { %p307_p9 = pnand %p1246_p7, %p306_p8 }
   0xf   : > { %v1587_v0 = vld [vmem:[%s2167_s3] sm:$0xff] (!%p307_p9)   ;;  %p351_p10 = scmp.lt.s32.totalorder (!%p307_p9), %s1780_s13, 1  ;;  %v1588_v1 = vld [vmem:[%s2167_s3 + $0x8] sm:$0xff] (!%p307_p9)   ;;  %v1589_v2 = vld [vmem:[%s2167_s3 + $0x10] sm:$0xff] (!%p307_p9)   ;;  %vm513_vm0 = vcmask (!%p307_p9), 523264   ;;  %v1704_v25 = vmov (!%p307_p9), 0.0|0.0  }
  0x10   : > { %310 = sbr.rel (%p307_p9) target bundleno = 777 (0x309), region = 52  ;;  %1378 = vmatprep.subr.bf16.mxu0 (!%p307_p9), %v1587_v0  ;;  %v1590_v4 = vld [vmem:[%s2167_s3 + $0x18] sm:$0xff] (!%p307_p9)   ;;  %v1864_v20 = vld [vmem:[%s2166_s2] sm:$0xff] (!%p307_p9)  ;;  %v944_v23 = vld [vmem:[%s2169_s5 + $0x8] sm:$0xff] (!%p307_p9)  ;;  %vm1705_vm1 = vmmov (!%p307_p9), 0   ;;  %vm933_vm2 = vcmask (!%p307_p9), 1043456  }
  0x11   : > { %1379 = vmatpush3.bf16.msra.mxu0 (!%p307_p9), %v1587_v0  ;;  %v757_v21 = vcombine.high (!%p307_p9), %v1864_v20, %v1864_v20  ;;  %v943_v22 = vld [vmem:[%s2169_s5] sm:$0xff] (!%p307_p9)  ;;  %v945_v24 = vld [vmem:[%s2169_s5 + $0x10] sm:$0xff] (!%p307_p9)  ;;  %v946_v27 = vld [vmem:[%s2169_s5 + $0x18] sm:$0xff] (!%p307_p9)  ;;  %s1291_s23 = sshll.u32 (!%p307_p9), %s1780_s13, 6 }
  0x12   : > { %1380 = vmatprep.subr.bf16.mxu0 (!%p307_p9), %v1588_v1  ;;  %v1529_v26 = vpack.c.bf16 (!%p307_p9), %v944_v23, %v943_v22  ;;  %v1532_v28 = vpack.c.bf16 (!%p307_p9), %v946_v27, %v945_v24  ;;  %v947_v29 = vld [vmem:[%s2169_s5 + $0x20] sm:$0xff] (!%p307_p9)  ;;  %v948_v30 = vld [vmem:[%s2169_s5 + $0x28] sm:$0xff] (!%p307_p9)  ;;  %s2093_s27 = scalar_lea.hbm (!%p307_p9), %s2172_s8, %s1291_s23 }
  0x13   : > { %823 = vmatprep.mubr.f32.mxu1 (!%p307_p9), %v757_v21  ;;  %v1535_v31 = vpack.c.bf16 (!%p307_p9), %v948_v30, %v947_v29  ;;  %v1893_v32 = vld [vmem:[%s2168_s4] ss:$0 sm:$0xff] (!%p307_p9) }
  0x15   : > { %1381 = vmatpush3.bf16.msra.mxu0 (!%p307_p9), %v1588_v1 }
  0x16   : > { %1382 = vmatprep.subr.bf16.mxu0 (!%p307_p9), %v1589_v2 }
  0x17   : > { %s1815_s25 = scalar_select %p351_p10, %s1780_s13, 1 }
  0x19   : > { %s1295_s28 = sshll.u32 %s1815_s25, 7  ;;  %1383 = vmatpush3.bf16.msra.mxu0 %v1589_v2  ;;  %s1296_s29 = sshll.u32 %s1815_s25, 8 }
  0x1a   : > { %s1824_s16 = scalar_lea.vmem %s2164_s0, %s1295_s28  ;;  %1384 = vmatprep.subr.bf16.mxu0 %v1590_v4  ;;  %s1978_s17 = scalar_lea.vmem %s2165_s1, %s1296_s29 }
  0x1b   : > { %v1591_v3 = vld [vmem:[%s1824_s16] sm:$0xff]   ;;  %v1592_v5 = vld [vmem:[%s1824_s16 + $0x8] sm:$0xff]   ;;  %v1593_v6 = vld [vmem:[%s1824_s16 + $0x10] sm:$0xff]   ;;  %s2086_s25 = sand.u32 1, %s1694_s10  }
  0x1c   : > { %1386 = vmatprep.mubr.msk.bf16.mxu0 %vm513_vm0, %v1591_v3  ;;  %v1594_v7 = vld [vmem:[%s1824_s16 + $0x18] sm:$0xff]   ;;  %v1595_v8 = vld [vmem:[%s1824_s16 + $0x20] sm:$0xff]   ;;  %v1596_v9 = vld [vmem:[%s1824_s16 + $0x28] sm:$0xff]   ;;  %s1247_s21 = sshll.u32 %s2086_s25, 2  ;;  %s1114_s29 = scalar_lea.sflag [#allocation3], %s2086_s25 }
  0x1d   : > { %1385 = vmatpush3.bf16.msra.mxu0 %v1590_v4  ;;  %v1597_v10 = vld [vmem:[%s1824_s16 + $0x30] sm:$0xff]   ;;  %v1598_v11 = vld [vmem:[%s1824_s16 + $0x38] sm:$0xff]   ;;  %v1599_v12 = vld [vmem:[%s1824_s16 + $0x40] sm:$0xff]   ;;  %s344_s22 = scalar_lea.vmem [#allocation2], %s1247_s21 }
  0x1e   : > { %v1600_v13 = vld [vmem:[%s1824_s16 + $0x48] sm:$0xff]   ;;  %v1601_v14 = vld [vmem:[%s1824_s16 + $0x50] sm:$0xff]   ;;  %v1602_v15 = vld [vmem:[%s1824_s16 + $0x58] sm:$0xff]   ;;  %1528 = vmatprep.subr.bf16.mxu0 %v1704_v25  ;;  %s1131_s28 = sshll.u32 %s344_s22, 4  ;;  %s1132_s28 = int_to_ptr.vmem [resolvable:$true] %s1131_s28 }
  0x1f   : > { %v1603_v16 = vld [vmem:[%s1824_s16 + $0x60] sm:$0xff]   ;;  %v1604_v17 = vld [vmem:[%s1824_s16 + $0x68] sm:$0xff]   ;;  %v1605_v18 = vld [vmem:[%s1824_s16 + $0x70] sm:$0xff]   ;;  %s1608_s14 = scalar_lea.vmem %s1132_s28, 64 }
  0x20   : > { %1387 = vmatmul.mubr.msk.bf16.vlgmr.msra.gmra.mrb[0].mxu0 %vm513_vm0, %v1592_v5  ;;  %v1606_v19 = vld [vmem:[%s1824_s16 + $0x78] sm:$0xff]   ;;  %p1609_p11 = scmp.ne.s32.totalorder %s1132_s28, %s1608_s14  ;;  %s1707_s16 = smov [#allocation2]  }
  0x21   : > { %1390 = vmatprep.mubr.msk.bf16.mxu0 %vm513_vm0, %v1593_v6  ;;  %1530 = vmatpush3.bf16.msra.mxu0 %v1529_v26 }
  0x22   : > { %1531 = vmatprep.subr.bf16.mxu0 %v1704_v25  ;;  %p1610_p12 = pnand %p1609_p11, %p1797_p5 }
  0x24   : > { %p1611_p13 = pneg %p1610_p12 }
  0x25   : > { %1533 = vmatpush3.bf16.msra.mxu0 %v1532_v28 }
  0x26   : > { %1534 = vmatprep.subr.bf16.mxu0 %v1704_v25 }
  0x28   : > { %1391 = vmatmul.mubr.msk.bf16.gmra.mrb[4].mxu0 %vm513_vm0, %v1594_v7 }
  0x29   : > { %1394 = vmatprep.mubr.msk.bf16.mxu0 %vm513_vm0, %v1595_v8  ;;  %1536 = vmatpush3.bf16.msra.mxu0 %v1535_v31 }
  0x2a   : > { %1537 = vmatprep.subr.bf16.mxu0 %v1704_v25 }
  0x30   : > { %1395 = vmatmul.mubr.msk.bf16.gmra.mrb[8].mxu0 %vm513_vm0, %v1596_v9 }
  0x31   : > { %1398 = vmatprep.mubr.msk.bf16.mxu0 %vm513_vm0, %v1597_v10 }
  0x38   : > { %1399 = vmatmul.mubr.msk.bf16.gmra.mrb[12].mxu0 %vm513_vm0, %v1598_v11 }
  0x39   : > { %1402 = vmatprep.mubr.msk.bf16.mxu0 %vm513_vm0, %v1599_v12 }
  0x40   : > { %1403 = vmatmul.mubr.msk.bf16.gmra.mrb[16].mxu0 %vm513_vm0, %v1600_v13 }
  0x41   : > { %1406 = vmatprep.mubr.msk.bf16.mxu0 %vm513_vm0, %v1601_v14 }
  0x48   : > { %1407 = vmatmul.mubr.msk.bf16.gmra.mrb[20].mxu0 %vm513_vm0, %v1602_v15 }
  0x49   : > { %1410 = vmatprep.mubr.msk.bf16.mxu0 %vm513_vm0, %v1603_v16 }
  0x50   : > { %1411 = vmatmul.mubr.msk.bf16.gmra.mrb[24].mxu0 %vm513_vm0, %v1604_v17 }
  0x51   : > { %1414 = vmatprep.mubr.msk.bf16.mxu0 %vm513_vm0, %v1605_v18 }
  0x58   : > { %1415 = vmatmul.mubr.msk.bf16.gmra.mrb[28].mxu0 %vm513_vm0, %v1606_v19 }
  0xf3   : > { %v1388_v33 = vpop.f32.mrb[0].mxu0 }
  0xf4   : > { %v605_v34 = vadd.f32 %v1388_v33, %v1893_v32  ;;  %v596_v35 = vpop.f32.mrb[1].mxu0 }
  0xf5   : > { %v597_v36 = vadd.f32 %v1893_v32, %v596_v35  ;;  %v1389_v37 = vpop.f32.mrb[2].mxu0 }
  0xf6   : > { %v608_v38 = vadd.f32 %v1389_v37, %v1893_v32  ;;  %v599_v39 = vpop.f32.mrb[3].mxu0  ;;  %v725_v41 = vmax.f32 %v605_v34, 0.0 }
  0xf7   : > { %v600_v40 = vadd.f32 %v1893_v32, %v599_v39  ;;  %v723_v43 = vmax.f32 %v597_v36, 0.0 }
  0xf8   : > { %v726_v42 = vmax.f32 %v608_v38, 0.0 }
  0xf9   : > { %v724_v44 = vmax.f32 %v600_v40, 0.0 }
  0xfa   : > { %v1899_v45 = vpack.c.bf16 %v726_v42, %v725_v41 }
  0xfb   : > { %v1392_v46 = vpop.f32.mrb[4].mxu0  ;;  %v1901_v47 = vpack.c.bf16 %v724_v44, %v723_v43 }
  0xfc   : > { %v621_v48 = vadd.f32 %v1392_v46, %v1893_v32  ;;  %v612_v49 = vpop.f32.mrb[5].mxu0 }
  0xfd   : > { %v613_v50 = vadd.f32 %v1893_v32, %v612_v49  ;;  %v1393_v51 = vpop.f32.mrb[6].mxu0 }
  0xfe   : > { %v624_v52 = vadd.f32 %v1393_v51, %v1893_v32  ;;  %v615_v53 = vpop.f32.mrb[7].mxu0  ;;  %v729_v55 = vmax.f32 %v621_v48, 0.0 }
  0xff   : > { %v616_v54 = vadd.f32 %v1893_v32, %v615_v53  ;;  %v727_v57 = vmax.f32 %v613_v50, 0.0 }
 0x100   : > { %v730_v56 = vmax.f32 %v624_v52, 0.0 }
 0x101   : > { %v728_v58 = vmax.f32 %v616_v54, 0.0 }
 0x102   : > { %v1907_v59 = vpack.c.bf16 %v730_v56, %v729_v55 }
 0x103   : > { %v1909_v60 = vpack.c.bf16 %v728_v58, %v727_v57  ;;  %v1396_v61 = vpop.f32.mrb[8].mxu0 }
 0x104   : > { %v637_v62 = vadd.f32 %v1396_v61, %v1893_v32  ;;  %v628_v63 = vpop.f32.mrb[9].mxu0 }
 0x105   : > { %v629_v0 = vadd.f32 %v1893_v32, %v628_v63  ;;  %v1397_v1 = vpop.f32.mrb[10].mxu0 }
 0x106   : > { %v640_v2 = vadd.f32 %v1397_v1, %v1893_v32  ;;  %v631_v3 = vpop.f32.mrb[11].mxu0  ;;  %v733_v5 = vmax.f32 %v637_v62, 0.0 }
 0x107   : > { %v632_v4 = vadd.f32 %v1893_v32, %v631_v3  ;;  %v731_v7 = vmax.f32 %v629_v0, 0.0 }
 0x108   : > { %v734_v6 = vmax.f32 %v640_v2, 0.0 }
 0x109   : > { %v732_v8 = vmax.f32 %v632_v4, 0.0 }
 0x10a   : > { %v1915_v9 = vpack.c.bf16 %v734_v6, %v733_v5 }
 0x10b   : > { %v1917_v10 = vpack.c.bf16 %v732_v8, %v731_v7  ;;  %v1400_v11 = vpop.f32.mrb[12].mxu0 }
 0x10c   : > { %v653_v12 = vadd.f32 %v1400_v11, %v1893_v32  ;;  %v644_v13 = vpop.f32.mrb[13].mxu0 }
 0x10d   : > { %v645_v14 = vadd.f32 %v1893_v32, %v644_v13  ;;  %v1401_v15 = vpop.f32.mrb[14].mxu0 }
 0x10e   : > { %v656_v16 = vadd.f32 %v1401_v15, %v1893_v32  ;;  %v647_v17 = vpop.f32.mrb[15].mxu0  ;;  %v737_v19 = vmax.f32 %v653_v12, 0.0 }
 0x10f   : > { %v648_v18 = vadd.f32 %v1893_v32, %v647_v17  ;;  %v735_v22 = vmax.f32 %v645_v14, 0.0 }
 0x110   : > { %v738_v21 = vmax.f32 %v656_v16, 0.0 }
 0x111   : > { %v736_v23 = vmax.f32 %v648_v18, 0.0 }
 0x112   : > { %v1923_v24 = vpack.c.bf16 %v738_v21, %v737_v19 }
 0x113   : > { %v1925_v26 = vpack.c.bf16 %v736_v23, %v735_v22  ;;  %v1404_v27 = vpop.f32.mrb[16].mxu0  ;;  %v951_v23 = vld [vmem:[%s2170_s6] sm:$0xff] }
 0x114   : > { %v669_v28 = vadd.f32 %v1404_v27, %v1893_v32  ;;  %v660_v29 = vpop.f32.mrb[17].mxu0 }
 0x115   : > { %v661_v30 = vadd.f32 %v1893_v32, %v660_v29  ;;  %v1405_v31 = vpop.f32.mrb[18].mxu0 }
 0x116   : > { %v672_v33 = vadd.f32 %v1405_v31, %v1893_v32  ;;  %v663_v34 = vpop.f32.mrb[19].mxu0  ;;  %v741_v36 = vmax.f32 %v669_v28, 0.0  ;;  %v956_v28 = vld [vmem:[%s2170_s6 + $0x28] sm:$0xff] }
 0x117   : > { %v664_v35 = vadd.f32 %v1893_v32, %v663_v34  ;;  %v739_v38 = vmax.f32 %v661_v30, 0.0  ;;  %v831_v30 = vld [vmem:[%s1978_s17 + $0x8] sm:$0xff]  ;;  %v832_v34 = vld [vmem:[%s1978_s17 + $0x10] sm:$0xff] }
 0x118   : > { %v742_v37 = vmax.f32 %v672_v33, 0.0  ;;  %v863_v33 = vsel %vm513_vm0, %v831_v30, 0.0  ;;  %v852_v30 = vld [vmem:[%s1978_s17 + $0xb0] sm:$0xff] }
 0x119   : > { %v740_v39 = vmax.f32 %v664_v35, 0.0 }
 0x11a   : > { %v1476_v40 = vpack.c.bf16 %v742_v37, %v741_v36  ;;  %v865_v36 = vsel %vm513_vm0, %v832_v34, 0.0  ;;  %v833_v37 = vld [vmem:[%s1978_s17 + $0x18] sm:$0xff] }
 0x11b   : > { %v1408_v41 = vpop.f32.mrb[20].mxu0  ;;  %v1472_v42 = vpack.c.bf16 %v740_v39, %v739_v38  ;;  %v867_v39 = vsel %vm513_vm0, %v833_v37, 0.0  ;;  %v853_v34 = vld [vmem:[%s1978_s17 + $0xb8] sm:$0xff]  ;;  %v854_v37 = vld [vmem:[%s1978_s17 + $0xc0] sm:$0xff] }
 0x11c   : > { %v685_v43 = vadd.f32 %v1408_v41, %v1893_v32  ;;  %v676_v44 = vpop.f32.mrb[21].mxu0 }
 0x11d   : > { %v677_v46 = vadd.f32 %v1893_v32, %v676_v44  ;;  %v1409_v48 = vpop.f32.mrb[22].mxu0  ;;  %1473 = vmatprep.subr.bf16.mxu1 %v1472_v42 }
 0x11e   : > { %v688_v49 = vadd.f32 %v1409_v48, %v1893_v32  ;;  %v679_v50 = vpop.f32.mrb[23].mxu0  ;;  %1475 = vmatpush3.bf16.msra.mxu1 %v1901_v47  ;;  %v745_v52 = vmax.f32 %v685_v43, 0.0  ;;  %v835_v43 = vld [vmem:[%s1978_s17 + $0x28] sm:$0xff]  ;;  %v836_v48 = vld [vmem:[%s1978_s17 + $0x30] sm:$0xff] }
 0x11f   : > { %v680_v51 = vadd.f32 %v1893_v32, %v679_v50  ;;  %1477 = vmatprep.subr.bf16.mxu1 %v1476_v40  ;;  %v743_v54 = vmax.f32 %v677_v46, 0.0  ;;  %v834_v40 = vld [vmem:[%s1978_s17 + $0x20] sm:$0xff]  ;;  %v871_v46 = vsel %vm513_vm0, %v835_v43, 0.0  ;;  %v873_v50 = vsel %vm513_vm0, %v836_v48, 0.0  ;;  %v856_v43 = vld [vmem:[%s1978_s17 + $0xd0] sm:$0xff]  ;;  %v857_v48 = vld [vmem:[%s1978_s17 + $0xd8] sm:$0xff] }
 0x120   : > { %v746_v53 = vmax.f32 %v688_v49, 0.0  ;;  %v869_v42 = vsel %vm513_vm0, %v834_v40, 0.0  ;;  %v855_v40 = vld [vmem:[%s1978_s17 + $0xc8] sm:$0xff] }
 0x121   : > { %v744_v55 = vmax.f32 %v680_v51, 0.0  ;;  %v837_v51 = vld [vmem:[%s1978_s17 + $0x38] sm:$0xff] }
 0x122   : > { %v1484_v56 = vpack.c.bf16 %v746_v53, %v745_v52  ;;  %1479 = vmatpush3.bf16.msra.mxu1 %v1899_v45  ;;  %v875_v53 = vsel %vm513_vm0, %v837_v51, 0.0  ;;  %v858_v51 = vld [vmem:[%s1978_s17 + $0xe0] sm:$0xff] }
 0x123   : > { %v1480_v57 = vpack.c.bf16 %v744_v55, %v743_v54  ;;  %v1412_v58 = vpop.f32.mrb[24].mxu0  ;;  %v838_v54 = vld [vmem:[%s1978_s17 + $0x40] sm:$0xff] }
 0x124   : > { %v701_v61 = vadd.f32 %v1412_v58, %v1893_v32  ;;  %v692_v62 = vpop.f32.mrb[25].mxu0 }
 0x125   : > { %v693_v63 = vadd.f32 %v1893_v32, %v692_v62  ;;  %v1413_v0 = vpop.f32.mrb[26].mxu0  ;;  %1481 = vmatprep.subr.bf16.mxu1 %v1480_v57  ;;  %v839_v57 = vld [vmem:[%s1978_s17 + $0x48] sm:$0xff]  ;;  %v840_v62 = vld [vmem:[%s1978_s17 + $0x50] sm:$0xff] }
 0x126   : > { %v704_v47 = vadd.f32 %v1413_v0, %v1893_v32  ;;  %v695_v1 = vpop.f32.mrb[27].mxu0  ;;  %1483 = vmatpush3.bf16.msra.mxu1 %v1909_v60  ;;  %v749_v3 = vmax.f32 %v701_v61, 0.0  ;;  %v879_v61 = vsel %vm513_vm0, %v839_v57, 0.0  ;;  %v881_v0 = vsel %vm513_vm0, %v840_v62, 0.0  ;;  %v958_v57 = vld [vmem:[%s2170_s6 + $0x38] sm:$0xff]  ;;  %v860_v62 = vld [vmem:[%s1978_s17 + $0xf0] sm:$0xff] }
 0x127   : > { %v696_v2 = vadd.f32 %v1893_v32, %v695_v1  ;;  %1485 = vmatprep.subr.bf16.mxu1 %v1484_v56  ;;  %v747_v45 = vmax.f32 %v693_v63, 0.0  ;;  %v877_v56 = vsel %vm513_vm0, %v838_v54, 0.0  ;;  %v859_v54 = vld [vmem:[%s1978_s17 + $0xe8] sm:$0xff] }
 0x128   : > { %v750_v4 = vmax.f32 %v704_v47, 0.0  ;;  %v841_v47 = vld [vmem:[%s1978_s17 + $0x58] sm:$0xff] }
 0x129   : > { %v748_v5 = vmax.f32 %v696_v2, 0.0  ;;  %v883_v2 = vsel %vm513_vm0, %v841_v47, 0.0  ;;  %v861_v47 = vld [vmem:[%s1978_s17 + $0xf8] sm:$0xff] }
 0x12a   : > { %v1492_v6 = vpack.c.bf16 %v750_v4, %v749_v3  ;;  %1487 = vmatpush3.bf16.msra.mxu1 %v1907_v59  ;;  %v842_v3 = vld [vmem:[%s1978_s17 + $0x60] sm:$0xff] }
 0x12b   : > { %v1488_v7 = vpack.c.bf16 %v748_v5, %v747_v45  ;;  %v1416_v8 = vpop.f32.mrb[28].mxu0  ;;  %v885_v45 = vsel %vm513_vm0, %v842_v3, 0.0  ;;  %v843_v5 = vld [vmem:[%s1978_s17 + $0x68] sm:$0xff] }
 0x12c   : > { %v717_v11 = vadd.f32 %v1416_v8, %v1893_v32  ;;  %v708_v12 = vpop.f32.mrb[29].mxu0  ;;  %v844_v8 = vld [vmem:[%s1978_s17 + $0x70] sm:$0xff]  ;;  %v960_v3 = vld [vmem:[%s2170_s6 + $0x48] sm:$0xff] }
 0x12d   : > { %v709_v13 = vadd.f32 %v1893_v32, %v708_v12  ;;  %v1417_v14 = vpop.f32.mrb[30].mxu0  ;;  %1489 = vmatprep.subr.bf16.mxu1 %v1488_v7  ;;  %v887_v7 = vsel %vm513_vm0, %v843_v5, 0.0  ;;  %v889_v12 = vsel %vm513_vm0, %v844_v8, 0.0  ;;  %v962_v8 = vld [vmem:[%s2170_s6 + $0x58] sm:$0xff] }
 0x12e   : > { %v720_v60 = vadd.f32 %v1417_v14, %v1893_v32  ;;  %v711_v15 = vpop.f32.mrb[31].mxu0  ;;  %1491 = vmatpush3.bf16.msra.mxu1 %v1917_v10  ;;  %v753_v17 = vmax.f32 %v717_v11, 0.0 }
 0x12f   : > { %v712_v16 = vadd.f32 %v1893_v32, %v711_v15  ;;  %1493 = vmatprep.subr.bf16.mxu1 %v1492_v6  ;;  %v751_v59 = vmax.f32 %v709_v13, 0.0  ;;  %v952_v32 = vld [vmem:[%s2170_s6 + $0x8] sm:$0xff]  ;;  %v845_v13 = vld [vmem:[%s1978_s17 + $0x78] sm:$0xff]  ;;  %v846_v15 = vld [vmem:[%s1978_s17 + $0x80] sm:$0xff] }
 0x130   : > { %v754_v18 = vmax.f32 %v720_v60, 0.0  ;;  %v1505_v10 = vpack.c.bf16 %v952_v32, %v951_v23  ;;  %v891_v60 = vsel %vm513_vm0, %v845_v13, 0.0  ;;  %v849_v32 = vld [vmem:[%s1978_s17 + $0x98] sm:$0xff] }
 0x131   : > { %v752_v19 = vmax.f32 %v712_v16, 0.0 }
 0x132   : > { %v1500_v21 = vpack.c.bf16 %v754_v18, %v753_v17  ;;  %1495 = vmatpush3.bf16.msra.mxu1 %v1915_v9  ;;  %v953_v9 = vld [vmem:[%s2170_s6 + $0x10] sm:$0xff]  ;;  %v893_v17 = vsel %vm513_vm0, %v846_v15, 0.0  ;;  %v847_v18 = vld [vmem:[%s1978_s17 + $0x88] sm:$0xff] }
 0x133   : > { %v1496_v22 = vpack.c.bf16 %v752_v19, %v751_v59  ;;  %v895_v19 = vsel %vm513_vm0, %v847_v18, 0.0  ;;  %v950_v18 = vld [vmem:[%s2169_s5 + $0x38] sm:$0xff] }
 0x135   : > { %1497 = vmatprep.subr.bf16.mxu1 %v1496_v22 }
 0x136   : > { %1499 = vmatpush3.bf16.msra.mxu1 %v1925_v26  ;;  %v954_v26 = vld [vmem:[%s2170_s6 + $0x18] sm:$0xff] }
 0x137   : > { %1501 = vmatprep.subr.bf16.mxu1 %v1500_v21  ;;  %v1508_v27 = vpack.c.bf16 %v954_v26, %v953_v9  ;;  %v848_v21 = vld [vmem:[%s1978_s17 + $0x90] sm:$0xff]  ;;  %v899_v9 = vsel %vm513_vm0, %v849_v32, 0.0  ;;  %v850_v26 = vld [vmem:[%s1978_s17 + $0xa0] sm:$0xff] }
 0x138   : > { %v897_v23 = vsel %vm513_vm0, %v848_v21, 0.0  ;;  %v965_v21 = vld [vmem:[%s2170_s6 + $0x70] sm:$0xff] }
 0x13a   : > { %1503 = vmatpush3.bf16.msra.mxu1 %v1923_v24  ;;  %v955_v24 = vld [vmem:[%s2170_s6 + $0x20] sm:$0xff] }
 0x13b   : > { %1504 = vmatprep.subr.bf16.mxu1 %v1704_v25  ;;  %v1511_v29 = vpack.c.bf16 %v956_v28, %v955_v24  ;;  %v901_v24 = vsel %vm513_vm0, %v850_v26, 0.0  ;;  %v851_v28 = vld [vmem:[%s1978_s17 + $0xa8] sm:$0xff] }
 0x13d   : > { %824 = vmatmul.mubr.f32.vlgmr.msra.gmra.mrb[0].mxu1 %v1864_v20  ;;  %v830_v20 = vld [vmem:[%s1978_s17] sm:$0xff]  ;;  %s1612_s17 = sshll.u32 %s1707_s16, 4  ;;  %s1613_s17 = int_to_ptr.vmem [resolvable:$false] %s1612_s17 }
 0x13e   : > { %1506 = vmatpush3.bf16.msra.mxu1 %v1505_v10  ;;  %v862_v31 = vsel %vm513_vm0, %v830_v20, 0.0  ;;  %v903_v20 = vsel %vm513_vm0, %v851_v28, 0.0  ;;  %s1614_s21 = scalar_lea.vmem %s1613_s17, 128  ;;  %p1615_p0 = scmp.lt.s32.totalorder %s1132_s28, %s1613_s17 }
 0x13f   : > { %1507 = vmatprep.subr.bf16.mxu1 %v1704_v25  ;;  %v864_v35 = vadd.f32 %v863_v33, %v862_v31  ;;  %v905_v33 = vsel %vm513_vm0, %v852_v30, 0.0  ;;  %p1616_p1 = scmp.lt.s32.totalorder %s1614_s21, %s1608_s14 }
 0x141   : > { %v866_v38 = vadd.f32 %v865_v36, %v864_v35  ;;  %v907_v36 = vsel %vm513_vm0, %v853_v34, 0.0  ;;  %p1617_p2 = por %p1616_p1, %p1615_p0 }
 0x142   : > { %1509 = vmatpush3.bf16.msra.mxu1 %v1508_v27 }
 0x143   : > { %1510 = vmatprep.subr.bf16.mxu1 %v1704_v25  ;;  %v868_v41 = vadd.f32 %v867_v39, %v866_v38  ;;  %v909_v39 = vsel %vm513_vm0, %v854_v37, 0.0  ;;  %p1618_p3 = pnand %p1617_p2, %p1611_p13 }
 0x145   : > { %v870_v44 = vadd.f32 %v869_v42, %v868_v41  ;;  %v911_v42 = vsel %vm513_vm0, %v855_v40, 0.0 }
 0x146   : > { %1512 = vmatpush3.bf16.msra.mxu1 %v1511_v29 }
 0x147   : > { %1513 = vmatprep.subr.bf16.mxu1 %v1704_v25  ;;  %v872_v49 = vadd.f32 %v871_v46, %v870_v44  ;;  %v913_v46 = vsel %vm513_vm0, %v856_v43, 0.0 }
 0x149   : > { %v874_v52 = vadd.f32 %v873_v50, %v872_v49  ;;  %v915_v50 = vsel %vm513_vm0, %v857_v48, 0.0 }
 0x14b   : > { %v876_v55 = vadd.f32 %v875_v53, %v874_v52  ;;  %v917_v53 = vsel %vm513_vm0, %v858_v51, 0.0 }
 0x14d   : > { %v878_v58 = vadd.f32 %v877_v56, %v876_v55  ;;  %v957_v56 = vld [vmem:[%s2170_s6 + $0x30] sm:$0xff] }
 0x14f   : > { %v880_v63 = vadd.f32 %v879_v61, %v878_v58  ;;  %v919_v58 = vsel %vm513_vm0, %v859_v54, 0.0  ;;  %v1514_v61 = vpack.c.bf16 %v958_v57, %v957_v56 }
 0x151   : > { %v882_v1 = vadd.f32 %v881_v0, %v880_v63  ;;  %v921_v0 = vsel %vm513_vm0, %v860_v62, 0.0  ;;  %1515 = vmatpush3.bf16.msra.mxu1 %v1514_v61 }
 0x152   : > { %1516 = vmatprep.subr.bf16.mxu1 %v1704_v25 }
 0x153   : > { %v884_v4 = vadd.f32 %v883_v2, %v882_v1  ;;  %v959_v2 = vld [vmem:[%s2170_s6 + $0x40] sm:$0xff] }
 0x155   : > { %v886_v6 = vadd.f32 %v885_v45, %v884_v4  ;;  %v923_v4 = vsel %vm513_vm0, %v861_v47, 0.0  ;;  %v1517_v45 = vpack.c.bf16 %v960_v3, %v959_v2 }
 0x157   : > { %v888_v11 = vadd.f32 %v887_v7, %v886_v6  ;;  %1518 = vmatpush3.bf16.msra.mxu1 %v1517_v45  ;;  %v961_v7 = vld [vmem:[%s2170_s6 + $0x50] sm:$0xff] }
 0x158   : > { %1519 = vmatprep.subr.bf16.mxu1 %v1704_v25 }
 0x159   : > { %v890_v14 = vadd.f32 %v889_v12, %v888_v11  ;;  %v1520_v11 = vpack.c.bf16 %v962_v8, %v961_v7 }
 0x15b   : > { %v892_v16 = vadd.f32 %v891_v60, %v890_v14  ;;  %1521 = vmatpush3.bf16.msra.mxu1 %v1520_v11  ;;  %v963_v14 = vld [vmem:[%s2170_s6 + $0x60] sm:$0xff]  ;;  %v964_v60 = vld [vmem:[%s2170_s6 + $0x68] sm:$0xff] }
 0x15c   : > { %1522 = vmatprep.subr.bf16.mxu1 %v1704_v25  ;;  %v1523_v15 = vpack.c.bf16 %v964_v60, %v963_v14 }
 0x15d   : > { %v894_v59 = vadd.f32 %v893_v17, %v892_v16  ;;  %v949_v17 = vld [vmem:[%s2169_s5 + $0x30] sm:$0xff] }
 0x15f   : > { %v896_v22 = vadd.f32 %v895_v19, %v894_v59  ;;  %1524 = vmatpush3.bf16.msra.mxu1 %v1523_v15  ;;  %v1538_v19 = vpack.c.bf16 %v950_v18, %v949_v17 }
 0x160   : > { %1525 = vmatprep.subr.bf16.mxu1 %v1704_v25 }
 0x161   : > { %v898_v10 = vadd.f32 %v897_v23, %v896_v22  ;;  %v966_v22 = vld [vmem:[%s2170_s6 + $0x78] sm:$0xff]  ;;  %1539 = vmatpush3.bf16.msra.mxu0 %v1538_v19 }
 0x162   : > { %v1526_v23 = vpack.c.bf16 %v966_v22, %v965_v21 }
 0x163   : > { %v900_v27 = vadd.f32 %v899_v9, %v898_v10  ;;  %v1706_v10 = vmov 0.0  }
 0x164   : > { %1527 = vmatpush3.bf16.msra.mxu1 %v1526_v23  ;;  %1469 = vmatprep.mubr.msk.f32.mxu0 %vm1705_vm1, %v1706_v10 }
 0x165   : > { %v902_v29 = vadd.f32 %v901_v24, %v900_v27  ;;  %1450 = vmatprep.mubr.msk.f32.mxu1 %vm1705_vm1, %v1706_v10 }
 0x167   : > { %v904_v31 = vadd.f32 %v903_v20, %v902_v29 }
 0x169   : > { %v906_v35 = vadd.f32 %v905_v33, %v904_v31 }
 0x16b   : > { %v908_v38 = vadd.f32 %v907_v36, %v906_v35 }
 0x16d   : > { %v910_v41 = vadd.f32 %v909_v39, %v908_v38 }
 0x16f   : > { %v912_v44 = vadd.f32 %v911_v42, %v910_v41 }
 0x171   : > { %v914_v49 = vadd.f32 %v913_v46, %v912_v44 }
 0x173   : > { %v916_v52 = vadd.f32 %v915_v50, %v914_v49 }
 0x175   : > { %v918_v55 = vadd.f32 %v917_v53, %v916_v52 }
 0x177   : > { %v920_v63 = vadd.f32 %v919_v58, %v918_v55 }
 0x179   : > { %v922_v1 = vadd.f32 %v921_v0, %v920_v63 }
 0x17b   : > { %v924_v5 = vadd.f32 %v923_v4, %v922_v1 }
 0x17d   : > { %v925_v6 = vrot.slane %v924_v5, 4 }
 0x17f   : > { %v926_v12 = vadd.f32 %v925_v6, %v924_v5 }
 0x181   : > { %v927_v13 = vrot.slane %v926_v12, 2 }
 0x183   : > { %v928_v16 = vadd.f32 %v927_v13, %v926_v12 }
 0x185   : > { %v929_v59 = vrot.slane %v928_v16, 1 }
 0x187   : > { %v930_v32 = vadd.f32 %v929_v59, %v928_v16 }
 0x189   : > { %v932_v9 = vmul.f32 0.00390625, %v930_v32 }
 0x18b   : > { %1470 = vmatmul.mubr.msk.f32.vlgmr.msra.gmra.mrb[32].mxu0 %vm513_vm0, %v932_v9 }
 0x210   : > { %v1349_v25 = vpop.f32.mrb[0].mxu1 }
 0x211   : > { %v1350_v26 = vpop.f32.mrb[1].mxu1 }
 0x212   : > { %v1351_v27 = vadd.f32 %v1350_v26, %v1349_v25 }
 0x214   : > { %829 = vst [vmem:[%s344_s22] sm:$0xf] %v1351_v27  ;;  %v934_v24 = vsel %vm933_vm2, %v1351_v27, 0.0 }
 0x215   : > { %v935_v28 = vrot.slane %v934_v24, 4 }
 0x217   : > { %v936_v29 = vadd.f32 %v935_v28, %v934_v24 }
 0x219   : > { %v937_v20 = vrot.slane %v936_v29, 2 }
 0x21b   : > { %v938_v30 = vadd.f32 %v937_v20, %v936_v29 }
 0x21d   : > { %v939_v31 = vrot.slane %v938_v30, 1 }
 0x21f   : > { %v940_v33 = vadd.f32 %v939_v31, %v938_v30 }
 0x221   : > { %v942_v34 = vmul.f32 0.25, %v940_v33 }
 0x223   : > { %1451 = vmatmul.mubr.f32.vlgmr.msra.gmra.mrb[2].mxu1 %v942_v34 }
 0x25e   : > { %v1106_v35 = vpop.f32.mrb[32].mxu0 }
 0x25f   : > { %v1471_v36 = vpop.f32.mrb[33].mxu0 }
 0x260   : > { %1621 = shalt.err (!%p1618_p3)
}
 0x261   : > { %s1622_s22 = scalar_lea.hbm %s2093_s27, 64  ;;  %s1626_s26 = scalar_lea.hbm %s2172_s8, 128 }
 0x262   : > { %p1623_p4 = scmp.ne.s32.totalorder %s2093_s27, %s1622_s22  ;;  %p1627_p9 = scmp.lt.u32.totalorder %s2093_s27, %s2172_s8 }
 0x263   : > { %p1628_p10 = scmp.lt.u32.totalorder %s1626_s26, %s1622_s22  ;;  %p1630_p12 = scmp.lt.u32.totalorder %s1622_s22, %s2093_s27 }
 0x264   : > { %p1624_p7 = pnand %p1623_p4, %p1797_p5 }
 0x265   : > { %p1629_p11 = por %p1628_p10, %p1627_p9 }
 0x266   : > { %p1625_p8 = pneg %p1624_p7 }
 0x267   : > { %p1631_p13 = por %p1630_p12, %p1629_p11 }
 0x269   : > { %p1632_p0 = pnand %p1631_p13, %p1625_p8 }
 0x26b   : > { %1635 = shalt.err (!%p1632_p0)
}
 0x26c   : > { %1540 = dma.vmem_to_hbm [thread:$0]  (%p1797_p5), %s1132_s28, 64, %s2093_s27, %s1114_s29   ;;  %v1110_v38 = vld [vmem:[%s2171_s7] sm:$0x1] }
 0x26d   : > { %s1292_s23 = sshll.u32 %s1780_s13, 4  ;;  %s350_s24 = scalar_lea.vmem [#allocation4], %s2086_s25 }
 0x26e   : > { %s1144_s26 = sshll.u32 %s350_s24, 4  ;;  %s2121_s17 = scalar_lea.hbm %s2173_s9, %s1292_s23  ;;  %s2123_s26 = int_to_ptr.vmem [resolvable:$true] %s1144_s26 }
 0x26f   : > { %s1119_s27 = scalar_lea.sflag [#allocation5], %s2086_s25  ;;  %s1636_s28 = scalar_lea.vmem %s2123_s26, 16 }
 0x270   : > { %p1637_p1 = scmp.ne.s32.totalorder %s2123_s26, %s1636_s28  ;;  %s1708_s13 = smov [#allocation4]  }
 0x271   : > { %s1640_s29 = sshll.u32 %s1708_s13, 4  ;;  %s1641_s29 = int_to_ptr.vmem [resolvable:$false] %s1640_s29 }
 0x272   : > { %p1638_p2 = pnand %p1637_p1, %p1797_p5  ;;  %s1642_s14 = scalar_lea.vmem %s1641_s29, 32 }
 0x273   : > { %p1643_p4 = scmp.lt.s32.totalorder %s2123_s26, %s1641_s29  ;;  %p1644_p7 = scmp.lt.s32.totalorder %s1642_s14, %s1636_s28 }
 0x274   : > { %p1639_p3 = pneg %p1638_p2 }
 0x275   : > { %p1645_p8 = por %p1644_p7, %p1643_p4 }
 0x277   : > { %p1646_p9 = pnand %p1645_p8, %p1639_p3 }
 0x2f6   : > { %v1033_v37 = vpop.f32.mrb[2].mxu1 }
 0x2f7   : > { %v1107_v39 = vadd.f32 %v1106_v35, %v1033_v37  ;;  %v1452_v40 = vpop.f32.mrb[3].mxu1 }
 0x2f9   : > { %v1111_v41 = vadd.f32 %v1110_v38, %v1107_v39 }
 0x2fb   : > { %1112 = vst [vmem:[%s350_s24] sm:$0x1] %v1111_v41 }
 0x2fc   : > { %1649 = shalt.err (!%p1646_p9)
}
 0x2fd   : > { %s1650_s25 = scalar_lea.hbm %s2121_s17, 16  ;;  %s1654_s24 = scalar_lea.hbm %s2173_s9, 32 }
 0x2fe   : > { %p1651_p10 = scmp.ne.s32.totalorder %s2121_s17, %s1650_s25  ;;  %p1655_p13 = scmp.lt.u32.totalorder %s2121_s17, %s2173_s9 }
 0x2ff   : > { %p1656_p0 = scmp.lt.u32.totalorder %s1654_s24, %s1650_s25  ;;  %p1658_p2 = scmp.lt.u32.totalorder %s1650_s25, %s2121_s17 }
 0x300   : > { %p1652_p11 = pnand %p1651_p10, %p1797_p5 }
 0x301   : > { %p1657_p1 = por %p1656_p0, %p1655_p13 }
 0x302   : > { %p1653_p12 = pneg %p1652_p11 }
 0x303   : > { %p1659_p3 = por %p1658_p2, %p1657_p1 }
 0x305   : > { %p1660_p4 = pnand %p1659_p3, %p1653_p12 }
 0x307   : > { %1663 = shalt.err (!%p1660_p4)
}
 0x308   : > { %1541 = dma.vmem_to_hbm [thread:$0]  (%p1797_p5), %s2123_s26, 16, %s2121_s17, %s1119_s27  }
 0x309 PF: > { %p1551_p7 = scmp.ge.s32.totalorder %s1702_s12, 2  ;;  %s1156_s28 = sand.u32 1, %s1690_s30  }
 0x30a   : > { %s1157_s13 = scalar_lea.sflag [#allocation3], %s1156_s28 }
 0x30b   : > { %p1545_p8 = pnand %p1551_p7, %p1801_p6 }
 0x30d   : > { %1681 = dma.done.wait (!%p1545_p8), %s1157_s13, 64  }
 0x30e   : > { %1683 = vsyncadd (!%p1545_p8), %s1157_s13, 4294967232  ;;  %s1166_s29 = scalar_lea.sflag [#allocation5], %s1156_s28 }
 0x30f   : > { %1685 = dma.done.wait (!%p1545_p8), %s1166_s29, 16  }
 0x310   : > { %1687 = vsyncadd (!%p1545_p8), %s1166_s29, 4294967280  ;;  %p23_p5 = scmp.ge.s32.totalorder %s1784_s15, 4   ;;  %s2176_s30 = smov %s1694_s10 }
 0x311   : > { %s2177_s10 = smov %s1698_s11  ;;  %s2178_s11 = smov %s1795_s18 }
 0x312   : > { %s2179_s12 = smov %s1784_s15  ;;  %25 = sbr.rel (!%p23_p5) target bundleno = 5 (0x5), region = 107 }
 0x319   :  { %1170 = vsyncpa [#allocation3], 1 }
 0x31a   :  { %1172 = vsyncpa [#allocation3 + $0x1], 1 }
 0x31b   :  { %1173 = vsyncpa [#allocation5], 1 }
 0x31c   :  { %1175 = vsyncpa [#allocation5 + $0x1], 1 }

</bundles_post_ra>
